<compile_context>
chip_gen: v5e
topology: v5e:2x2
jax: 0.10.0
libtpu: 0.0.40
codegen_flags: <defaults>
</compile_context>

<pallas_src>
import functools

import jax
import jax.numpy as jnp
from jax.experimental import pallas as pl
from jax.experimental.pallas import tpu as pltpu

LANE = 128     # lane width (last dim)
SUBLANE = 8    # f32 sublane height (second-to-last dim)


def _round_up(x, m):
    return (x + m - 1) // m * m


def _pad2d(a, rows, cols, dtype=None):
    out = jnp.zeros((rows, cols), a.dtype if dtype is None else dtype)
    return out.at[: a.shape[0], : a.shape[1]].set(a.astype(out.dtype))


# --------------------------- Fused forward kernel ---------------------------
def _make_fused_kernel(n_layer, n_pad):
    """n_pad: number of (padded) node rows; rows [n_pad:] of the stacked input are edges."""

    def _sigmoid(z):
        # sigmoid(z) == 0.5*tanh(0.5*z)+0.5 : one EUP op + cheap VPU mul/add
        return 0.5 * jnp.tanh(0.5 * z) + 0.5

    def kernel(x01_ref, inc_ref, inc_t_ref, w_hid_ref, b_hid_ref,
               w_n2e_ref, w_e2n_ref, vec_ref, w_out_ref, b_out_ref, out_ref):
        bf16 = jnp.bfloat16
        inc = inc_ref[...]            # (Np, Ep) bf16, 0/1 exact
        inc_t = inc_t_ref[...]        # (Ep, Np) bf16 — pre-transposed in wrapper

        # Collapsed to_hidden stack: one bf16 MXU matmul on the stacked [Np+Ep, Fp] slab.
        hid = (
            jnp.dot(x01_ref[...], w_hid_ref[...],
                    preferred_element_type=jnp.float32)
            + b_hid_ref[...]
        )
        x0 = hid[:n_pad, :]           # (Np, Hp) f32 node feats
        x1 = hid[n_pad:, :]           # (Ep, Hp) f32 edge feats

        for i in range(n_layer):
            w_n2e = w_n2e_ref[i]      # (Hp, Hp)   bf16
            w_e2n = w_e2n_ref[i]      # (2Hp, Hp)  bf16
            vec = vec_ref[i]          # (8, Hp)    f32
            b_n2e = vec[0:1, :]
            b_e2n = vec[1:2, :]
            bn_n_scale = vec[2:3, :]
            bn_n_shift = vec[3:4, :]
            bn_e_scale = vec[4:5, :]
            bn_e_shift = vec[5:6, :]

            # node -> hyperedge messaging func: sigmoid(Linear(x0))
            node_msg = _sigmoid(
                jnp.dot(x0.astype(bf16), w_n2e,
                        preferred_element_type=jnp.float32)
                + b_n2e
            )
            # aggregate node messages onto hyperedges: B1^T @ m
            node_msg_agg = jnp.dot(inc_t, node_msg.astype(bf16),
                                   preferred_element_type=jnp.float32)  # (Ep, Hp)

            # hyperedge -> node messaging func: sigmoid(Linear(concat([x1, m0], -1)))
            # single K=2*Hp MXU contraction (fills the 256-deep v6e/v7x MXU once).
            xm = jnp.concatenate(
                [x1.astype(bf16), node_msg_agg.astype(bf16)], axis=-1)   # (Ep, 2Hp)
            edge_msg = _sigmoid(
                jnp.dot(xm, w_e2n, preferred_element_type=jnp.float32) + b_e2n
            )
            # aggregate hyperedge messages onto nodes: B1 @ m
            edge_msg_agg = jnp.dot(inc, edge_msg.astype(bf16),
                                   preferred_element_type=jnp.float32)  # (Np, Hp)

            # updating func: sigmoid(BatchNorm(x) + dropout(msg)), eval mode.
            x0 = _sigmoid(x0 * bn_n_scale + bn_n_shift + edge_msg_agg)
            x1 = _sigmoid(x1 * bn_e_scale + bn_e_shift + node_msg_agg)

        # to_categories_linear on node features -> (padded) logits
        out_ref[...] = (
            jnp.dot(x0.astype(bf16), w_out_ref[...],
                    preferred_element_type=jnp.float32)
            + b_out_ref[...]
        )

    return kernel


# --------------------------- Forward wrapper ---------------------------
@functools.partial(jax.jit, static_argnames=("num_classes",))
def hmpnn_forward(params, x_0, x_1, incidence_1, *, num_classes):
    n_nodes, in_features = x_0.shape
    n_edges = x_1.shape[0]
    n_layer = params["w_n2e"].shape[0]

    n_pad = _round_up(max(n_nodes, SUBLANE), SUBLANE)
    e_pad = _round_up(max(n_edges, SUBLANE), SUBLANE)
    f_pad = params["w_hid"].shape[0]
    c_pad = params["w_out"].shape[1]

    # Pad + stack node and edge features into one row-filled [Np+Ep, Fp] bf16 operand
    # (the MXU operand is bf16 anyway; halves DMA bytes vs f32).
    x01 = jnp.zeros((n_pad + e_pad, f_pad), jnp.bfloat16)
    x01 = x01.at[:n_nodes, :in_features].set(x_0.astype(jnp.bfloat16))
    x01 = x01.at[n_pad:n_pad + n_edges, :in_features].set(x_1.astype(jnp.bfloat16))

    # Both incidence orientations as bf16 (0/1 exact); transpose done once on host side,
    # so the layer loop never emits an in-kernel XLU transpose.
    inc = _pad2d(incidence_1.astype(jnp.float32), n_pad, e_pad, jnp.bfloat16)
    inc_t = _pad2d(incidence_1.astype(jnp.float32).T, e_pad, n_pad, jnp.bfloat16)

    flat_inputs = [
        x01, inc, inc_t,
        params["w_hid"], params["b_hid"],
        params["w_n2e"], params["w_e2n"], params["layer_vec"],
        params["w_out"], params["b_out"],
    ]

    out_bytes = n_pad * c_pad * 4
    in_bytes = sum(int(a.size) * a.dtype.itemsize for a in flat_inputs)
    # explicit scoped-VMEM limit (v5e default is only 16 MiB); toy sizes need far less.
    vmem_limit = int(min(max(16 << 20, 3 * (in_bytes + out_bytes) + (2 << 20)), 48 << 20))

    vmem = pl.BlockSpec(memory_space=pltpu.MemorySpace.VMEM)
    out_padded = pl.pallas_call(
        _make_fused_kernel(n_layer, n_pad),
        out_shape=jax.ShapeDtypeStruct((n_pad, c_pad), jnp.float32),
        in_specs=[vmem] * len(flat_inputs),
        out_specs=vmem,
        compiler_params=pltpu.CompilerParams(vmem_limit_bytes=vmem_limit),
    )(*flat_inputs)

    return out_padded[:n_nodes, :num_classes]


# --------------------------- Deterministic parameter init ---------------------------
def _init_linear_params(key, fan_in, fan_out):
    # mirrors torch.nn.Linear default init: U(-1/sqrt(fan_in), 1/sqrt(fan_in))
    kw, kb = jax.random.split(key)
    bound = 1.0 / (fan_in ** 0.5)
    w = jax.random.uniform(kw, (fan_out, fan_in), jnp.float32, -bound, bound)
    b = jax.random.uniform(kb, (fan_out,), jnp.float32, -bound, bound)
    return w, b


def init_hmpnn(key, in_features, hidden_features, num_classes, n_layer=2):
    dims = (in_features,) + tuple(hidden_features)
    h = dims[-1]
    f_pad = _round_up(in_features, LANE)
    h_pad = _round_up(h, LANE)
    c_pad = _round_up(num_classes, LANE)

    keys = jax.random.split(key, (len(dims) - 1) + 2 * n_layer + 1)

    # --- to_hidden_linear: compose the Linear stack (no nonlinearity between) into one (W, b)
    wt = jnp.eye(in_features, dtype=jnp.float32)      # running x @ W^T composition
    b = jnp.zeros((in_features,), jnp.float32)
    for i in range(len(dims) - 1):
        w_i, b_i = _init_linear_params(keys[i], dims[i], dims[i + 1])
        wt = wt @ w_i.T                               # (in_features, dims[i+1])
        b = b @ w_i.T + b_i
    w_hid = _pad2d(wt, f_pad, h_pad, jnp.bfloat16)
    b_hid = _pad2d(b.reshape(1, -1), 1, h_pad, jnp.float32)

    # --- HMPNN layers: stacked along a leading n_layer axis (few big DMAs, not 9*L tiny ones)
    eps = 1e-5
    bn_scale_val = 1.0 / float(jnp.sqrt(jnp.float32(1.0 + eps)))

    w_n2e_all, w_e2n_all, vec_all = [], [], []
    for i in range(n_layer):
        k1 = keys[(len(dims) - 1) + 2 * i]
        k2 = keys[(len(dims) - 1) + 2 * i + 1]
        w_n2e, b_n2e = _init_linear_params(k1, h, h)        # Linear(h, h) + Sigmoid
        w_e2n, b_e2n = _init_linear_params(k2, 2 * h, h)    # Linear(2h, h) on concat([x1, m0])
        w_e2n_t = w_e2n.T                                   # (2h, h): rows [:h]->x1, [h:]->m0

        w_n2e_all.append(_pad2d(w_n2e.T, h_pad, h_pad, jnp.bfloat16))
        w_e2n_pad = jnp.zeros((2 * h_pad, h_pad), jnp.bfloat16)
        w_e2n_pad = w_e2n_pad.at[:h, :h].set(w_e2n_t[:h, :].astype(jnp.bfloat16))
        w_e2n_pad = w_e2n_pad.at[h_pad:h_pad + h, :h].set(w_e2n_t[h:, :].astype(jnp.bfloat16))
        w_e2n_all.append(w_e2n_pad)

        # per-layer vectors packed into 8 sublanes:
        # 0: b_n2e, 1: b_e2n, 2: bn_n_scale, 3: bn_n_shift, 4: bn_e_scale, 5: bn_e_shift
        vec = jnp.zeros((8, h_pad), jnp.float32)
        vec = vec.at[0, :h].set(b_n2e)
        vec = vec.at[1, :h].set(b_e2n)
        vec = vec.at[2, :h].set(bn_scale_val)   # eval-mode BN (running mean=0, var=1, affine id)
        vec = vec.at[3, :h].set(0.0)
        vec = vec.at[4, :h].set(bn_scale_val)
        vec = vec.at[5, :h].set(0.0)
        vec_all.append(vec)

    # --- to_categories_linear
    w_out, b_out = _init_linear_params(keys[-1], h, num_classes)
    return {
        "w_hid": w_hid, "b_hid": b_hid,
        "w_n2e": jnp.stack(w_n2e_all),          # (L, Hp, Hp)   bf16
        "w_e2n": jnp.stack(w_e2n_all),          # (L, 2Hp, Hp)  bf16
        "layer_vec": jnp.stack(vec_all),        # (L, 8, Hp)    f32
        "w_out": _pad2d(w_out.T, h_pad, c_pad, jnp.bfloat16),
        "b_out": _pad2d(b_out.reshape(1, -1), 1, c_pad, jnp.float32),
    }


if __name__ == "__main__":
    key = jax.random.PRNGKey(0)
    k_x0, k_x1, k_inc, k_par = jax.random.split(key, 4)

    n_nodes, n_hyperedges = 16, 12
    in_features = 8
    hidden_features = (16, 32)
    num_classes = 4
    n_layer = 2

    x_0 = jax.random.normal(k_x0, (n_nodes, in_features), jnp.float32)
    x_1 = jax.random.normal(k_x1, (n_hyperedges, in_features), jnp.float32)
    incidence_1 = (
        jax.random.uniform(k_inc, (n_nodes, n_hyperedges)) < 0.3
    ).astype(jnp.float32)

    params = init_hmpnn(k_par, in_features, hidden_features, num_classes, n_layer)

    y_pred = hmpnn_forward(params, x_0, x_1, incidence_1, num_classes=num_classes)
    jax.block_until_ready(y_pred)
    assert y_pred.shape == (n_nodes, num_classes)
    assert bool(jnp.all(jnp.isfinite(y_pred)))
    print("KERNEL_OK")
</pallas_src>

<mosaic_0001>
module attributes {stable_mosaic.version = 11 : i64} {
  func.func @kernel(%arg0: memref<32x128xbf16, #tpu.memory_space<vmem>>, %arg1: memref<16x16xbf16, #tpu.memory_space<vmem>>, %arg2: memref<16x16xbf16, #tpu.memory_space<vmem>>, %arg3: memref<128x128xbf16, #tpu.memory_space<vmem>>, %arg4: memref<1x128xf32, #tpu.memory_space<vmem>>, %arg5: memref<2x128x128xbf16, #tpu.memory_space<vmem>>, %arg6: memref<2x256x128xbf16, #tpu.memory_space<vmem>>, %arg7: memref<2x8x128xf32, #tpu.memory_space<vmem>>, %arg8: memref<128x128xbf16, #tpu.memory_space<vmem>>, %arg9: memref<1x128xf32, #tpu.memory_space<vmem>>, %arg10: memref<16x128xf32, #tpu.memory_space<vmem>>) attributes {dimension_semantics = [], scalar_prefetch = 0 : i64, scratch_operands = 0 : i64, tpu.core_type = #tpu.core_type<tc>} {
    %c0 = arith.constant 0 : index
    %c0_0 = arith.constant 0 : index
    %0 = vector.load %arg1[%c0, %c0_0] : memref<16x16xbf16, #tpu.memory_space<vmem>>, vector<16x16xbf16>
    %c0_1 = arith.constant 0 : index
    %c0_2 = arith.constant 0 : index
    %1 = vector.load %arg2[%c0_1, %c0_2] : memref<16x16xbf16, #tpu.memory_space<vmem>>, vector<16x16xbf16>
    %c0_3 = arith.constant 0 : index
    %c0_4 = arith.constant 0 : index
    %2 = vector.load %arg0[%c0_3, %c0_4] : memref<32x128xbf16, #tpu.memory_space<vmem>>, vector<32x128xbf16>
    %c0_5 = arith.constant 0 : index
    %c0_6 = arith.constant 0 : index
    %3 = vector.load %arg3[%c0_5, %c0_6] : memref<128x128xbf16, #tpu.memory_space<vmem>>, vector<128x128xbf16>
    %cst = arith.constant dense<0.000000e+00> : vector<32x128xf32>
    %4 = tpu.matmul %2, %3, %cst {dimension_numbers = #tpu.dot_dimension_numbers<[1], [0], [0], [1], [0, 0, 1, 1], [], []>} : vector<32x128xbf16>, vector<128x128xbf16>, vector<32x128xf32> -> vector<32x128xf32>
    %c0_7 = arith.constant 0 : index
    %c0_8 = arith.constant 0 : index
    %5 = vector.load %arg4[%c0_7, %c0_8] : memref<1x128xf32, #tpu.memory_space<vmem>>, vector<1x128xf32>
    %6 = vector.broadcast %5 : vector<1x128xf32> to vector<32x128xf32>
    %7 = arith.addf %4, %6 : vector<32x128xf32>
    %8 = vector.extract_strided_slice %7 {offsets = [0, 0], sizes = [16, 128], strides = [1, 1]} : vector<32x128xf32> to vector<16x128xf32>
    %9 = vector.extract_strided_slice %7 {offsets = [16, 0], sizes = [16, 128], strides = [1, 1]} : vector<32x128xf32> to vector<16x128xf32>
    %c0_9 = arith.constant 0 : index
    %c0_10 = arith.constant 0 : index
    %c0_11 = arith.constant 0 : index
    %10 = vector.load %arg5[%c0_9, %c0_10, %c0_11] : memref<2x128x128xbf16, #tpu.memory_space<vmem>>, vector<1x128x128xbf16>
    %11 = vector.shape_cast %10 : vector<1x128x128xbf16> to vector<128x128xbf16>
    %c0_12 = arith.constant 0 : index
    %c0_13 = arith.constant 0 : index
    %c0_14 = arith.constant 0 : index
    %12 = vector.load %arg6[%c0_12, %c0_13, %c0_14] : memref<2x256x128xbf16, #tpu.memory_space<vmem>>, vector<1x256x128xbf16>
    %13 = vector.shape_cast %12 : vector<1x256x128xbf16> to vector<256x128xbf16>
    %c0_15 = arith.constant 0 : index
    %c0_16 = arith.constant 0 : index
    %c0_17 = arith.constant 0 : index
    %14 = vector.load %arg7[%c0_15, %c0_16, %c0_17] : memref<2x8x128xf32, #tpu.memory_space<vmem>>, vector<1x8x128xf32>
    %15 = vector.shape_cast %14 : vector<1x8x128xf32> to vector<8x128xf32>
    %16 = vector.extract_strided_slice %15 {offsets = [0, 0], sizes = [1, 128], strides = [1, 1]} : vector<8x128xf32> to vector<1x128xf32>
    %17 = vector.extract_strided_slice %15 {offsets = [1, 0], sizes = [1, 128], strides = [1, 1]} : vector<8x128xf32> to vector<1x128xf32>
    %18 = vector.extract_strided_slice %15 {offsets = [2, 0], sizes = [1, 128], strides = [1, 1]} : vector<8x128xf32> to vector<1x128xf32>
    %19 = vector.extract_strided_slice %15 {offsets = [3, 0], sizes = [1, 128], strides = [1, 1]} : vector<8x128xf32> to vector<1x128xf32>
    %20 = vector.extract_strided_slice %15 {offsets = [4, 0], sizes = [1, 128], strides = [1, 1]} : vector<8x128xf32> to vector<1x128xf32>
    %21 = vector.extract_strided_slice %15 {offsets = [5, 0], sizes = [1, 128], strides = [1, 1]} : vector<8x128xf32> to vector<1x128xf32>
    %22 = arith.truncf %8 : vector<16x128xf32> to vector<16x128xbf16>
    %cst_18 = arith.constant dense<0.000000e+00> : vector<16x128xf32>
    %23 = tpu.matmul %22, %11, %cst_18 {dimension_numbers = #tpu.dot_dimension_numbers<[1], [0], [0], [1], [0, 0, 1, 1], [], []>} : vector<16x128xbf16>, vector<128x128xbf16>, vector<16x128xf32> -> vector<16x128xf32>
    %24 = vector.broadcast %16 : vector<1x128xf32> to vector<16x128xf32>
    %25 = arith.addf %23, %24 : vector<16x128xf32>
    %cst_19 = arith.constant 5.000000e-01 : f32
    %26 = vector.broadcast %cst_19 : f32 to vector<16x128xf32>
    %27 = arith.mulf %26, %25 : vector<16x128xf32>
    %28 = math.tanh %27 : vector<16x128xf32>
    %cst_20 = arith.constant 5.000000e-01 : f32
    %29 = vector.broadcast %cst_20 : f32 to vector<16x128xf32>
    %30 = arith.mulf %29, %28 : vector<16x128xf32>
    %cst_21 = arith.constant 5.000000e-01 : f32
    %31 = vector.broadcast %cst_21 : f32 to vector<16x128xf32>
    %32 = arith.addf %30, %31 : vector<16x128xf32>
    %33 = arith.truncf %32 : vector<16x128xf32> to vector<16x128xbf16>
    %cst_22 = arith.constant dense<0.000000e+00> : vector<16x128xf32>
    %34 = tpu.matmul %1, %33, %cst_22 {dimension_numbers = #tpu.dot_dimension_numbers<[1], [0], [0], [1], [0, 0, 1, 1], [], []>} : vector<16x16xbf16>, vector<16x128xbf16>, vector<16x128xf32> -> vector<16x128xf32>
    %35 = arith.truncf %9 : vector<16x128xf32> to vector<16x128xbf16>
    %36 = arith.truncf %34 : vector<16x128xf32> to vector<16x128xbf16>
    %37 = tpu.concatenate %35, %36 in 1 : vector<16x128xbf16>, vector<16x128xbf16> -> vector<16x256xbf16>
    %cst_23 = arith.constant dense<0.000000e+00> : vector<16x128xf32>
    %38 = tpu.matmul %37, %13, %cst_23 {dimension_numbers = #tpu.dot_dimension_numbers<[1], [0], [0], [1], [0, 0, 1, 1], [], []>} : vector<16x256xbf16>, vector<256x128xbf16>, vector<16x128xf32> -> vector<16x128xf32>
    %39 = vector.broadcast %17 : vector<1x128xf32> to vector<16x128xf32>
    %40 = arith.addf %38, %39 : vector<16x128xf32>
    %cst_24 = arith.constant 5.000000e-01 : f32
    %41 = vector.broadcast %cst_24 : f32 to vector<16x128xf32>
    %42 = arith.mulf %41, %40 : vector<16x128xf32>
    %43 = math.tanh %42 : vector<16x128xf32>
    %cst_25 = arith.constant 5.000000e-01 : f32
    %44 = vector.broadcast %cst_25 : f32 to vector<16x128xf32>
    %45 = arith.mulf %44, %43 : vector<16x128xf32>
    %cst_26 = arith.constant 5.000000e-01 : f32
    %46 = vector.broadcast %cst_26 : f32 to vector<16x128xf32>
    %47 = arith.addf %45, %46 : vector<16x128xf32>
    %48 = arith.truncf %47 : vector<16x128xf32> to vector<16x128xbf16>
    %cst_27 = arith.constant dense<0.000000e+00> : vector<16x128xf32>
    %49 = tpu.matmul %0, %48, %cst_27 {dimension_numbers = #tpu.dot_dimension_numbers<[1], [0], [0], [1], [0, 0, 1, 1], [], []>} : vector<16x16xbf16>, vector<16x128xbf16>, vector<16x128xf32> -> vector<16x128xf32>
    %50 = vector.broadcast %18 : vector<1x128xf32> to vector<16x128xf32>
    %51 = arith.mulf %8, %50 : vector<16x128xf32>
    %52 = vector.broadcast %19 : vector<1x128xf32> to vector<16x128xf32>
    %53 = arith.addf %51, %52 : vector<16x128xf32>
    %54 = arith.addf %53, %49 : vector<16x128xf32>
    %cst_28 = arith.constant 5.000000e-01 : f32
    %55 = vector.broadcast %cst_28 : f32 to vector<16x128xf32>
    %56 = arith.mulf %55, %54 : vector<16x128xf32>
    %57 = math.tanh %56 : vector<16x128xf32>
    %cst_29 = arith.constant 5.000000e-01 : f32
    %58 = vector.broadcast %cst_29 : f32 to vector<16x128xf32>
    %59 = arith.mulf %58, %57 : vector<16x128xf32>
    %cst_30 = arith.constant 5.000000e-01 : f32
    %60 = vector.broadcast %cst_30 : f32 to vector<16x128xf32>
    %61 = arith.addf %59, %60 : vector<16x128xf32>
    %62 = vector.broadcast %20 : vector<1x128xf32> to vector<16x128xf32>
    %63 = arith.mulf %9, %62 : vector<16x128xf32>
    %64 = vector.broadcast %21 : vector<1x128xf32> to vector<16x128xf32>
    %65 = arith.addf %63, %64 : vector<16x128xf32>
    %66 = arith.addf %65, %34 : vector<16x128xf32>
    %cst_31 = arith.constant 5.000000e-01 : f32
    %67 = vector.broadcast %cst_31 : f32 to vector<16x128xf32>
    %68 = arith.mulf %67, %66 : vector<16x128xf32>
    %69 = math.tanh %68 : vector<16x128xf32>
    %cst_32 = arith.constant 5.000000e-01 : f32
    %70 = vector.broadcast %cst_32 : f32 to vector<16x128xf32>
    %71 = arith.mulf %70, %69 : vector<16x128xf32>
    %cst_33 = arith.constant 5.000000e-01 : f32
    %72 = vector.broadcast %cst_33 : f32 to vector<16x128xf32>
    %73 = arith.addf %71, %72 : vector<16x128xf32>
    %c1 = arith.constant 1 : index
    %c0_34 = arith.constant 0 : index
    %c0_35 = arith.constant 0 : index
    %74 = vector.load %arg5[%c1, %c0_34, %c0_35] : memref<2x128x128xbf16, #tpu.memory_space<vmem>>, vector<1x128x128xbf16>
    %75 = vector.shape_cast %74 : vector<1x128x128xbf16> to vector<128x128xbf16>
    %c1_36 = arith.constant 1 : index
    %c0_37 = arith.constant 0 : index
    %c0_38 = arith.constant 0 : index
    %76 = vector.load %arg6[%c1_36, %c0_37, %c0_38] : memref<2x256x128xbf16, #tpu.memory_space<vmem>>, vector<1x256x128xbf16>
    %77 = vector.shape_cast %76 : vector<1x256x128xbf16> to vector<256x128xbf16>
    %c1_39 = arith.constant 1 : index
    %c0_40 = arith.constant 0 : index
    %c0_41 = arith.constant 0 : index
    %78 = vector.load %arg7[%c1_39, %c0_40, %c0_41] : memref<2x8x128xf32, #tpu.memory_space<vmem>>, vector<1x8x128xf32>
    %79 = vector.shape_cast %78 : vector<1x8x128xf32> to vector<8x128xf32>
    %80 = vector.extract_strided_slice %79 {offsets = [0, 0], sizes = [1, 128], strides = [1, 1]} : vector<8x128xf32> to vector<1x128xf32>
    %81 = vector.extract_strided_slice %79 {offsets = [1, 0], sizes = [1, 128], strides = [1, 1]} : vector<8x128xf32> to vector<1x128xf32>
    %82 = vector.extract_strided_slice %79 {offsets = [2, 0], sizes = [1, 128], strides = [1, 1]} : vector<8x128xf32> to vector<1x128xf32>
    %83 = vector.extract_strided_slice %79 {offsets = [3, 0], sizes = [1, 128], strides = [1, 1]} : vector<8x128xf32> to vector<1x128xf32>
    %84 = arith.truncf %61 : vector<16x128xf32> to vector<16x128xbf16>
    %cst_42 = arith.constant dense<0.000000e+00> : vector<16x128xf32>
    %85 = tpu.matmul %84, %75, %cst_42 {dimension_numbers = #tpu.dot_dimension_numbers<[1], [0], [0], [1], [0, 0, 1, 1], [], []>} : vector<16x128xbf16>, vector<128x128xbf16>, vector<16x128xf32> -> vector<16x128xf32>
    %86 = vector.broadcast %80 : vector<1x128xf32> to vector<16x128xf32>
    %87 = arith.addf %85, %86 : vector<16x128xf32>
    %cst_43 = arith.constant 5.000000e-01 : f32
    %88 = vector.broadcast %cst_43 : f32 to vector<16x128xf32>
    %89 = arith.mulf %88, %87 : vector<16x128xf32>
    %90 = math.tanh %89 : vector<16x128xf32>
    %cst_44 = arith.constant 5.000000e-01 : f32
    %91 = vector.broadcast %cst_44 : f32 to vector<16x128xf32>
    %92 = arith.mulf %91, %90 : vector<16x128xf32>
    %cst_45 = arith.constant 5.000000e-01 : f32
    %93 = vector.broadcast %cst_45 : f32 to vector<16x128xf32>
    %94 = arith.addf %92, %93 : vector<16x128xf32>
    %95 = arith.truncf %94 : vector<16x128xf32> to vector<16x128xbf16>
    %cst_46 = arith.constant dense<0.000000e+00> : vector<16x128xf32>
    %96 = tpu.matmul %1, %95, %cst_46 {dimension_numbers = #tpu.dot_dimension_numbers<[1], [0], [0], [1], [0, 0, 1, 1], [], []>} : vector<16x16xbf16>, vector<16x128xbf16>, vector<16x128xf32> -> vector<16x128xf32>
    %97 = arith.truncf %73 : vector<16x128xf32> to vector<16x128xbf16>
    %98 = arith.truncf %96 : vector<16x128xf32> to vector<16x128xbf16>
    %99 = tpu.concatenate %97, %98 in 1 : vector<16x128xbf16>, vector<16x128xbf16> -> vector<16x256xbf16>
    %cst_47 = arith.constant dense<0.000000e+00> : vector<16x128xf32>
    %100 = tpu.matmul %99, %77, %cst_47 {dimension_numbers = #tpu.dot_dimension_numbers<[1], [0], [0], [1], [0, 0, 1, 1], [], []>} : vector<16x256xbf16>, vector<256x128xbf16>, vector<16x128xf32> -> vector<16x128xf32>
    %101 = vector.broadcast %81 : vector<1x128xf32> to vector<16x128xf32>
    %102 = arith.addf %100, %101 : vector<16x128xf32>
    %cst_48 = arith.constant 5.000000e-01 : f32
    %103 = vector.broadcast %cst_48 : f32 to vector<16x128xf32>
    %104 = arith.mulf %103, %102 : vector<16x128xf32>
    %105 = math.tanh %104 : vector<16x128xf32>
    %cst_49 = arith.constant 5.000000e-01 : f32
    %106 = vector.broadcast %cst_49 : f32 to vector<16x128xf32>
    %107 = arith.mulf %106, %105 : vector<16x128xf32>
    %cst_50 = arith.constant 5.000000e-01 : f32
    %108 = vector.broadcast %cst_50 : f32 to vector<16x128xf32>
    %109 = arith.addf %107, %108 : vector<16x128xf32>
    %110 = arith.truncf %109 : vector<16x128xf32> to vector<16x128xbf16>
    %cst_51 = arith.constant dense<0.000000e+00> : vector<16x128xf32>
    %111 = tpu.matmul %0, %110, %cst_51 {dimension_numbers = #tpu.dot_dimension_numbers<[1], [0], [0], [1], [0, 0, 1, 1], [], []>} : vector<16x16xbf16>, vector<16x128xbf16>, vector<16x128xf32> -> vector<16x128xf32>
    %112 = vector.broadcast %82 : vector<1x128xf32> to vector<16x128xf32>
    %113 = arith.mulf %61, %112 : vector<16x128xf32>
    %114 = vector.broadcast %83 : vector<1x128xf32> to vector<16x128xf32>
    %115 = arith.addf %113, %114 : vector<16x128xf32>
    %116 = arith.addf %115, %111 : vector<16x128xf32>
    %cst_52 = arith.constant 5.000000e-01 : f32
    %117 = vector.broadcast %cst_52 : f32 to vector<16x128xf32>
    %118 = arith.mulf %117, %116 : vector<16x128xf32>
    %119 = math.tanh %118 : vector<16x128xf32>
    %cst_53 = arith.constant 5.000000e-01 : f32
    %120 = vector.broadcast %cst_53 : f32 to vector<16x128xf32>
    %121 = arith.mulf %120, %119 : vector<16x128xf32>
    %cst_54 = arith.constant 5.000000e-01 : f32
    %122 = vector.broadcast %cst_54 : f32 to vector<16x128xf32>
    %123 = arith.addf %121, %122 : vector<16x128xf32>
    %124 = arith.truncf %123 : vector<16x128xf32> to vector<16x128xbf16>
    %c0_55 = arith.constant 0 : index
    %c0_56 = arith.constant 0 : index
    %125 = vector.load %arg8[%c0_55, %c0_56] : memref<128x128xbf16, #tpu.memory_space<vmem>>, vector<128x128xbf16>
    %cst_57 = arith.constant dense<0.000000e+00> : vector<16x128xf32>
    %126 = tpu.matmul %124, %125, %cst_57 {dimension_numbers = #tpu.dot_dimension_numbers<[1], [0], [0], [1], [0, 0, 1, 1], [], []>} : vector<16x128xbf16>, vector<128x128xbf16>, vector<16x128xf32> -> vector<16x128xf32>
    %c0_58 = arith.constant 0 : index
    %c0_59 = arith.constant 0 : index
    %127 = vector.load %arg9[%c0_58, %c0_59] : memref<1x128xf32, #tpu.memory_space<vmem>>, vector<1x128xf32>
    %128 = vector.broadcast %127 : vector<1x128xf32> to vector<16x128xf32>
    %129 = arith.addf %126, %128 : vector<16x128xf32>
    %c0_60 = arith.constant 0 : index
    %c0_61 = arith.constant 0 : index
    %130 = vector.load %arg10[%c0_60, %c0_61] : memref<16x128xf32, #tpu.memory_space<vmem>>, vector<16x128xf32>
    tpu.vector_store %arg10[%c0_60, %c0_61], %129 {strides = array<i32>} : memref<16x128xf32, #tpu.memory_space<vmem>>, vector<16x128xf32>,
    return
  }
}

</mosaic_0001>

<bundles_post_ra>
// kernel: hmpnn_forward.1
= control target key start
LH: loop header
LB: loop body
LE: loop exit
PB: predicated region body
PF: predicated region fallthrough
CT: control target
= control target key end

     0   :  { %15 = vsyncpa [#allocation3], 0  ;;  %s1576_s0 = inlined_call_operand.vmem [shape: bf16[32,128], index: 0, kind: input, shape index: {}]   ;;  %s1577_s1 = inlined_call_operand.vmem [shape: bf16[16,16], index: 1, kind: input, shape index: {}]   ;;  %s1578_s2 = inlined_call_operand.vmem [shape: bf16[16,16], index: 2, kind: input, shape index: {}]   ;;  %s1579_s3 = inlined_call_operand.vmem [shape: bf16[128,128], index: 3, kind: input, shape index: {}]   ;;  %s1580_s4 = inlined_call_operand.vmem [shape: f32[1,128], index: 4, kind: input, shape index: {}]   ;;  %s1581_s5 = inlined_call_operand.hbm [shape: bf16[2,128,128], index: 5, kind: input, shape index: {}]   ;;  %s1582_s6 = inlined_call_operand.hbm [shape: bf16[2,256,128], index: 6, kind: input, shape index: {}]   ;;  %s1583_s7 = inlined_call_operand.vmem [shape: f32[2,8,128], index: 7, kind: input, shape index: {}]   ;;  %s1584_s8 = inlined_call_operand.hbm [shape: bf16[128,128], index: 8, kind: input, shape index: {}]   ;;  %s1585_s9 = inlined_call_operand.vmem [shape: f32[1,128], index: 9, kind: input, shape index: {}]   ;;  %s1586_s10 = inlined_call_operand.vmem [shape: f32[16,128], index: 10, kind: output, shape index: {}]  }
   0x1   :  { %16 = vsyncpa [#allocation5], 0  ;;  %s44_s15 = sshll.u32 %s1582_s6, 4  ;;  %s1405_s16 = smov [#allocation4]   ;;  %s45_s15 = int_to_ptr.hbm [resolvable:$true] %s44_s15 }
   0x2   :  { %s46_s17 = sshll.u32 %s1405_s16, 4  ;;  %s31_s20 = sshll.u32 %s1581_s5, 4  ;;  %s47_s17 = int_to_ptr.vmem [resolvable:$true] %s46_s17  ;;  %s32_s20 = int_to_ptr.hbm [resolvable:$true] %s31_s20 }
   0x3   :  { %s1406_s21 = smov 64   ;;  %s1407_s22 = smov 4  }
   0x4   :  { %52 = dma.hbm_to_vmem [thread:$0]  %s45_s15, 4096, %s47_s17, [#allocation5], %s1406_s21, %s1406_s21, %s1407_s22  }
   0x5   :  { %s1408_s23 = smov [#allocation2]   ;;  %s59_s27 = sshll.u32 %s1584_s8, 4  ;;  %s60_s27 = int_to_ptr.hbm [resolvable:$true] %s59_s27 }
   0x6   :  { %s33_s24 = sshll.u32 %s1408_s23, 4  ;;  %s1409_s6 = smov [#allocation6]   ;;  %s34_s24 = int_to_ptr.vmem [resolvable:$true] %s33_s24 }
   0x7   :  { %39 = dma.hbm_to_vmem [thread:$0]  %s32_s20, 2048, %s34_s24, [#allocation3], %s1406_s21, %s1406_s21, %s1407_s22  }
   0x8   :  { %s61_s28 = sshll.u32 %s1409_s6, 4  ;;  %s62_s28 = int_to_ptr.vmem [resolvable:$true] %s61_s28 }
   0x9   :  { %67 = dma.hbm_to_vmem [thread:$0]  %s60_s27, 1024, %s62_s28, [#allocation5], %s1406_s21, %s1406_s21, %s1407_s22  }
   0xa   :  { %1401 = dma.done.wait [#allocation3], 2048  }
   0xb   :  { %1402 = vsyncadd [#allocation3], 4294965248 }
   0xc   :  { %1403 = dma.done.wait [#allocation5], 5120  }
   0xd   :  { %1404 = vsyncadd [#allocation5], 4294962176  ;;  %v1237_v0 = vld [vmem:[%s1579_s3 + $0x38] sm:$0xff]  ;;  %v1236_v1 = vld [vmem:[%s1579_s3 + $0x30] sm:$0xff]  ;;  %vm317_vm0 = vcmask 130048  }
   0xe   :  { %171 = vmatpush.bf16.msra.mxu0 %v1237_v0  ;;  %v1245_v2 = vld [vmem:[#allocation2 + $0x38] sm:$0xff]  ;;  %v1244_v3 = vld [vmem:[#allocation2 + $0x30] sm:$0xff]  ;;  %v1235_v4 = vld [vmem:[%s1579_s3 + $0x28] sm:$0xff] }
   0xf   :  { %289 = vmatpush.bf16.msra.mxu1 %v1245_v2  ;;  %v1243_v5 = vld [vmem:[#allocation2 + $0x28] sm:$0xff]  ;;  %v1234_v6 = vld [vmem:[%s1579_s3 + $0x20] sm:$0xff]  ;;  %v1233_v8 = vld [vmem:[%s1579_s3 + $0x18] sm:$0xff] }
  0x10   :  { %v1242_v7 = vld [vmem:[#allocation2 + $0x20] sm:$0xff]  ;;  %v1241_v9 = vld [vmem:[#allocation2 + $0x18] sm:$0xff]  ;;  %v1232_v10 = vld [vmem:[%s1579_s3 + $0x10] sm:$0xff] }
  0x11   :  { %v1231_v11 = vld [vmem:[%s1579_s3 + $0x8] sm:$0xff]  ;;  %v1230_v12 = vld [vmem:[%s1579_s3] sm:$0xff]  ;;  %v1240_v14 = vld [vmem:[#allocation2 + $0x10] sm:$0xff] }
  0x12   :  { %172 = vmatpush.bf16.msra.mxu0 %v1236_v1  ;;  %v1228_v13 = vld [vmem:[%s1576_s0] sm:$0xff]  ;;  %v1239_v15 = vld [vmem:[#allocation2 + $0x8] sm:$0xff]  ;;  %v1253_v26 = vld [vmem:[#allocation4 + $0x38] sm:$0xff] }
  0x13   :  { %290 = vmatpush.bf16.msra.mxu1 %v1244_v3  ;;  %v1238_v16 = vld [vmem:[#allocation2] sm:$0xff]  ;;  %v1229_v23 = vld [vmem:[%s1576_s0 + $0x8] sm:$0xff]  ;;  %448 = vmatpush.bf16.msra.mxu3 %v1253_v26  ;;  %v1252_v27 = vld [vmem:[#allocation4 + $0x30] sm:$0xff] }
  0x14   :  { %v1504_v18 = vld [vmem:[%s1580_s4] ss:$0 sm:$0xff]  ;;  %v1251_v30 = vld [vmem:[#allocation4 + $0x28] sm:$0xff]  ;;  %v1261_v42 = vld [vmem:[#allocation4 + $0x78] sm:$0xff] }
  0x15   :  { %v1520_v24 = vld [vmem:[%s1583_s7] sm:$0xff]  ;;  %v1260_v45 = vld [vmem:[#allocation4 + $0x70] sm:$0xff]  ;;  %v1259_v46 = vld [vmem:[#allocation4 + $0x68] sm:$0xff] }
  0x16   :  { %173 = vmatpush.bf16.msra.mxu0 %v1235_v4  ;;  %v240_v25 = vperm.slane %v1520_v24, 0  ;;  %v1250_v32 = vld [vmem:[#allocation4 + $0x20] sm:$0xff]  ;;  %v1249_v47 = vld [vmem:[#allocation4 + $0x18] sm:$0xff]  ;;  %v1248_v49 = vld [vmem:[#allocation4 + $0x10] sm:$0xff] }
  0x17   :  { %291 = vmatpush.bf16.msra.mxu1 %v1243_v5  ;;  %449 = vmatpush.bf16.msra.mxu3 %v1252_v27  ;;  %v1526_v44 = vld [vmem:[%s1578_s2] sm:$0xff]  ;;  %v1257_v50 = vld [vmem:[#allocation4 + $0x58] sm:$0xff]  ;;  %v1247_v51 = vld [vmem:[#allocation4 + $0x8] sm:$0xff] }
  0x18   :  { %v1258_v48 = vld [vmem:[#allocation4 + $0x60] sm:$0xff]  ;;  %v1256_v52 = vld [vmem:[#allocation4 + $0x50] sm:$0xff]  ;;  %v1255_v54 = vld [vmem:[#allocation4 + $0x48] sm:$0xff] }
  0x19   :  { %v1246_v53 = vld [vmem:[#allocation4] sm:$0xff]  ;;  %v1277_v1 = vld [vmem:[#allocation4 + $0xb8] sm:$0xff]  ;;  %v1276_v2 = vld [vmem:[#allocation4 + $0xb0] sm:$0xff] }
  0x1a   :  { %174 = vmatpush.bf16.msra.mxu0 %v1234_v6  ;;  %v1254_v55 = vld [vmem:[#allocation4 + $0x40] sm:$0xff]  ;;  %v1275_v3 = vld [vmem:[#allocation4 + $0xa8] sm:$0xff]  ;;  %v1273_v5 = vld [vmem:[#allocation4 + $0x98] sm:$0xff] }
  0x1b   :  { %292 = vmatpush.bf16.msra.mxu1 %v1242_v7  ;;  %450 = vmatpush.bf16.msra.mxu3 %v1251_v30  ;;  %v1274_v4 = vld [vmem:[#allocation4 + $0xa0] sm:$0xff]  ;;  %v1272_v6 = vld [vmem:[#allocation4 + $0x90] sm:$0xff]  ;;  %v523_v7 = vperm.slane %v1520_v24, 4 }
  0x1e   :  { %175 = vmatpush.bf16.msra.mxu0 %v1233_v8  ;;  %v1271_v8 = vld [vmem:[#allocation4 + $0x88] sm:$0xff] }
  0x1f   :  { %293 = vmatpush.bf16.msra.mxu1 %v1241_v9  ;;  %451 = vmatpush.bf16.msra.mxu3 %v1250_v32 }
  0x22   :  { %176 = vmatpush.bf16.msra.mxu0 %v1232_v10  ;;  %v526_v10 = vperm.slane %v1520_v24, 5 }
  0x23   :  { %294 = vmatpush.bf16.msra.mxu1 %v1240_v14  ;;  %452 = vmatpush.bf16.msra.mxu3 %v1249_v47 }
  0x26   :  { %177 = vmatpush.bf16.msra.mxu0 %v1231_v11  ;;  %v1270_v11 = vld [vmem:[#allocation4 + $0x80] sm:$0xff] }
  0x27   :  { %295 = vmatpush.bf16.msra.mxu1 %v1239_v15  ;;  %453 = vmatpush.bf16.msra.mxu3 %v1248_v49 }
  0x2a   :  { %178 = vmatpush.bf16.msra.mxu0 %v1230_v12 }
  0x2b   :  { %296 = vmatpush.bf16.msra.mxu1 %v1238_v16  ;;  %454 = vmatpush.bf16.msra.mxu3 %v1247_v51 }
  0x2d   :  { %179 = vmatmul.bf16.vlgmr.msra.gmra.mxu0 %v1228_v13 }
  0x2f   :  { %455 = vmatpush.bf16.msra.mxu3 %v1246_v53 }
  0x3d   :  { %184 = vmatmul.bf16.gmra.mxu0 %v1229_v23 }
  0xaa   :  { %v180_v17 = vpop.f32.mrf.mxu0 }
  0xab   :  { %v1507_v20 = vadd.f32 %v1504_v18, %v180_v17 }
  0xb2   :  { %v182_v19 = vpop.f32.mrf.mxu0 }
  0xb3   :  { %v1510_v21 = vadd.f32 %v1504_v18, %v182_v19 }
  0xb5   :  { %v239_v22 = vpack.c.bf16 %v1510_v21, %v1507_v20 }
  0xb7   :  { %297 = vmatmul.bf16.vlgmr.msra.gmra.mxu1 %v239_v22 }
  0xba   :  { %v185_v56 = vpop.f32.mrf.mxu0 }
  0xbb   :  { %v186_v57 = vadd.f32 %v1504_v18, %v185_v56 }
  0xbd   :  { %v335_v58 = vpack.c.bf16 %v186_v57, %v186_v57  ;;  %v524_v9 = vmul.f32 %v523_v7, %v186_v57 }
  0xbf   :  { %v341_v61 = vunpack.c.l.b16 %v335_v58  ;;  %v527_v12 = vadd.f32 %v526_v10, %v524_v9 }
  0xc2   :  { %v187_v59 = vpop.f32.mrf.mxu0 }
  0xc3   :  { %v188_v60 = vadd.f32 %v1504_v18, %v187_v59 }
  0xc5   :  { %v336_v62 = vpack.c.bf16 %v188_v60, %v188_v60  ;;  %v525_v15 = vmul.f32 %v523_v7, %v188_v60 }
  0xc7   :  { %v342_v63 = vunpack.c.l.b16 %v336_v62  ;;  %v528_v18 = vadd.f32 %v526_v10, %v525_v15  ;;  %v1267_v62 = vld [vmem:[#allocation2 + $0x68] sm:$0xff] }
  0xc9   :  { %v343_v0 = vpack.c.b16 %v342_v63, %v341_v61  ;;  %v1538_v61 = vld [vmem:[%s1577_s1] sm:$0xff] }
  0xca   :  { %v1266_v63 = vld [vmem:[#allocation2 + $0x60] sm:$0xff] }
  0xcb   :  { %456 = vmatmul.bf16.vlgmr.msra.gmra.mxu3 %v343_v0  ;;  %v1265_v0 = vld [vmem:[#allocation2 + $0x58] sm:$0xff] }
 0x134   :  { %v298_v28 = vpop.f32.mrf.mxu1 }
 0x135   :  { %v299_v29 = vadd.f32 %v298_v28, %v240_v25 }
 0x137   :  { %v303_v31 = vmul.f32 0.5, %v299_v29 }
 0x139   :  { %1301 = vtanh.f32 %v303_v31 }
 0x13c   :  { %v300_v33 = vpop.f32.mrf.mxu1 }
 0x13d   :  { %v301_v34 = vadd.f32 %v300_v33, %v240_v25 }
 0x13f   :  { %v304_v35 = vmul.f32 0.5, %v301_v34  ;;  %v1302_v36 = vpop.eup %1301 }
 0x140   :  { %v307_v37 = vmul.f32 0.5, %v1302_v36 }
 0x141   :  { %1303 = vtanh.f32 %v304_v35 }
 0x142   :  { %v309_v40 = vadd.f32 0.5, %v307_v37 }
 0x147   :  { %v1304_v38 = vpop.eup %1303 }
 0x148   :  { %v308_v39 = vmul.f32 0.5, %v1304_v38 }
 0x14a   :  { %v310_v41 = vadd.f32 0.5, %v308_v39 }
 0x14c   :  { %v311_v43 = vpack.c.bf16 %v310_v41, %v309_v40  ;;  %v351_v41 = vperm.slane %v1520_v24, 1 }
 0x14e   :  { %328 = vmatpush.bf16.msra.mxu2 %v311_v43  ;;  %v457_v40 = vpop.f32.mrf.mxu3 }
 0x14f   :  { %v458_v43 = vadd.f32 %v457_v40, %v351_v41 }
 0x151   :  { %1025 = vmatmul.msk.bf16.vlgmr.msra.gmra.mxu2 %vm317_vm0, %v1526_v44 }
 0x152   :  { %462 = vmatpush.bf16.msrb.mxu2 %v1261_v42  ;;  %v1269_v42 = vld [vmem:[#allocation2 + $0x78] sm:$0xff] }
 0x153   :  { %641 = vmatpush.bf16.msrb.mxu0 %v1269_v42  ;;  %v1281_v42 = vld [vmem:[#allocation4 + $0xd8] sm:$0xff] }
 0x156   :  { %463 = vmatpush.bf16.msrb.mxu2 %v1260_v45  ;;  %v1268_v45 = vld [vmem:[#allocation2 + $0x70] sm:$0xff] }
 0x157   :  { %642 = vmatpush.bf16.msrb.mxu0 %v1268_v45  ;;  %v1279_v45 = vld [vmem:[#allocation4 + $0xc8] sm:$0xff] }
 0x15a   :  { %464 = vmatpush.bf16.msrb.mxu2 %v1259_v46 }
 0x15b   :  { %643 = vmatpush.bf16.msrb.mxu0 %v1267_v62 }
 0x15e   :  { %465 = vmatpush.bf16.msrb.mxu2 %v1258_v48  ;;  %v459_v48 = vpop.f32.mrf.mxu3 }
 0x15f   :  { %644 = vmatpush.bf16.msrb.mxu0 %v1266_v63 }
 0x162   :  { %466 = vmatpush.bf16.msrb.mxu2 %v1257_v50  ;;  %v460_v50 = vadd.f32 %v459_v48, %v351_v41 }
 0x163   :  { %645 = vmatpush.bf16.msrb.mxu0 %v1265_v0 }
 0x166   :  { %467 = vmatpush.bf16.msrb.mxu2 %v1256_v52 }
 0x16a   :  { %468 = vmatpush.bf16.msrb.mxu2 %v1255_v54 }
 0x16e   :  { %469 = vmatpush.bf16.msrb.mxu2 %v1254_v55 }
 0x172   :  { %791 = vmatpush.bf16.msra.mxu2 %v1277_v1  ;;  %v1264_v1 = vld [vmem:[#allocation2 + $0x50] sm:$0xff] }
 0x173   :  { %646 = vmatpush.bf16.msrb.mxu0 %v1264_v1 }
 0x176   :  { %792 = vmatpush.bf16.msra.mxu2 %v1276_v2  ;;  %v1263_v2 = vld [vmem:[#allocation2 + $0x48] sm:$0xff] }
 0x177   :  { %647 = vmatpush.bf16.msrb.mxu0 %v1263_v2 }
 0x17a   :  { %793 = vmatpush.bf16.msra.mxu2 %v1275_v3  ;;  %v1262_v3 = vld [vmem:[#allocation2 + $0x40] sm:$0xff] }
 0x17b   :  { %648 = vmatpush.bf16.msrb.mxu0 %v1262_v3 }
 0x17e   :  { %794 = vmatpush.bf16.msra.mxu2 %v1274_v4  ;;  %v507_v4 = vperm.slane %v1520_v24, 2 }
 0x180   :  { %v509_v10 = vmul.f32 %v507_v4, %v1510_v21  ;;  %v1555_v21 = vld [vmem:[%s1583_s7 + $0x8] sm:$0xff] }
 0x182   :  { %795 = vmatpush.bf16.msra.mxu2 %v1273_v5  ;;  %v508_v5 = vmul.f32 %v507_v4, %v1507_v20 }
 0x186   :  { %796 = vmatpush.bf16.msra.mxu2 %v1272_v6  ;;  %v510_v6 = vperm.slane %v1520_v24, 3 }
 0x188   :  { %v511_v7 = vadd.f32 %v510_v6, %v508_v5 }
 0x18a   :  { %797 = vmatpush.bf16.msra.mxu2 %v1271_v8 }
 0x18e   :  { %798 = vmatpush.bf16.msra.mxu2 %v1270_v11 }
 0x1d4   :  { %v330_v13 = vpop.f32.mrf.mxu2 }
 0x1d5   :  { %v529_v14 = vadd.f32 %v527_v12, %v330_v13  ;;  %v337_v17 = vpack.c.bf16 %v330_v13, %v330_v13  ;;  %v512_v12 = vadd.f32 %v510_v6, %v509_v10  ;;  %v1291_v10 = vld [vmem:[#allocation6 + $0x28] sm:$0xff] }
 0x1d7   :  { %v531_v16 = vmul.f32 0.5, %v529_v14  ;;  %v347_v26 = vunpack.c.l.b16 %v337_v17 }
 0x1d9   :  { %1305 = vtanh.f32 %v531_v16 }
 0x1dc   :  { %v332_v19 = vpop.f32.mrf.mxu2 }
 0x1dd   :  { %v338_v22 = vpack.c.bf16 %v332_v19, %v332_v19  ;;  %v530_v23 = vadd.f32 %v528_v18, %v332_v19 }
 0x1df   :  { %v1306_v25 = vpop.eup %1305  ;;  %v348_v27 = vunpack.c.l.b16 %v338_v22  ;;  %v532_v28 = vmul.f32 0.5, %v530_v23  ;;  %v592_v23 = vperm.slane %v1555_v21, 0 }
 0x1e0   :  { %v535_v30 = vmul.f32 0.5, %v1306_v25  ;;  %v1285_v25 = vld [vmem:[#allocation4 + $0xf8] sm:$0xff] }
 0x1e1   :  { %1307 = vtanh.f32 %v532_v28  ;;  %v349_v29 = vpack.c.b16 %v348_v27, %v347_v26  ;;  %v1284_v26 = vld [vmem:[#allocation4 + $0xf0] sm:$0xff] }
 0x1e2   :  { %v537_v31 = vadd.f32 0.5, %v535_v30 }
 0x1e3   :  { %470 = vmatmul.bf16.vlgmr.msrb.gmra.mxu2 %v349_v29  ;;  %v1283_v29 = vld [vmem:[#allocation4 + $0xe8] sm:$0xff] }
 0x1e4   :  { %v678_v34 = vpack.c.bf16 %v537_v31, %v537_v31  ;;  %v1282_v31 = vld [vmem:[#allocation4 + $0xe0] sm:$0xff] }
 0x1e6   :  { %v684_v37 = vunpack.c.l.b16 %v678_v34 }
 0x1e7   :  { %v1308_v32 = vpop.eup %1307 }
 0x1e8   :  { %v536_v33 = vmul.f32 0.5, %v1308_v32 }
 0x1ea   :  { %v538_v35 = vadd.f32 0.5, %v536_v33 }
 0x1ec   :  { %v679_v36 = vpack.c.bf16 %v538_v35, %v538_v35 }
 0x1ee   :  { %v685_v38 = vunpack.c.l.b16 %v679_v36 }
 0x1f0   :  { %v686_v39 = vpack.c.b16 %v685_v38, %v684_v37 }
 0x1f3   :  { %799 = vmatmul.bf16.vlgmr.msra.gmra.mxu2 %v686_v39 }
 0x266   :  { %v471_v46 = vpop.f32.mrf.mxu2 }
 0x267   :  { %v472_v47 = vadd.f32 %v471_v46, %v458_v43  ;;  %v1280_v43 = vld [vmem:[#allocation4 + $0xd0] sm:$0xff]  ;;  %v1278_v46 = vld [vmem:[#allocation4 + $0xc0] sm:$0xff] }
 0x269   :  { %v476_v49 = vmul.f32 0.5, %v472_v47 }
 0x26b   :  { %1309 = vtanh.f32 %v476_v49 }
 0x26e   :  { %v473_v51 = vpop.f32.mrf.mxu2 }
 0x26f   :  { %v474_v52 = vadd.f32 %v473_v51, %v460_v50 }
 0x271   :  { %v477_v53 = vmul.f32 0.5, %v474_v52  ;;  %v1310_v54 = vpop.eup %1309 }
 0x272   :  { %v480_v55 = vmul.f32 0.5, %v1310_v54 }
 0x273   :  { %1311 = vtanh.f32 %v477_v53 }
 0x274   :  { %v482_v58 = vadd.f32 0.5, %v480_v55  ;;  %v694_v55 = vperm.slane %v1555_v21, 1 }
 0x276   :  { %v800_v54 = vpop.f32.mrf.mxu2 }
 0x279   :  { %v1312_v56 = vpop.eup %1311 }
 0x27a   :  { %v481_v57 = vmul.f32 0.5, %v1312_v56  ;;  %v801_v56 = vadd.f32 %v800_v54, %v694_v55 }
 0x27c   :  { %v483_v59 = vadd.f32 0.5, %v481_v57  ;;  %v1292_v57 = vld [vmem:[#allocation6 + $0x30] sm:$0xff] }
 0x27e   :  { %v484_v60 = vpack.c.bf16 %v483_v59, %v482_v58 }
 0x280   :  { %500 = vmatpush.bf16.msrb.mxu1 %v484_v60  ;;  %v802_v60 = vpop.f32.mrf.mxu2 }
 0x281   :  { %v803_v63 = vadd.f32 %v802_v60, %v694_v55 }
 0x283   :  { %1094 = vmatmul.msk.bf16.vlgmr.msrb.gmra.mxu1 %vm317_vm0, %v1538_v61 }
 0x284   :  { %805 = vmatpush.bf16.msra.mxu1 %v1285_v25 }
 0x288   :  { %806 = vmatpush.bf16.msra.mxu1 %v1284_v26 }
 0x28c   :  { %807 = vmatpush.bf16.msra.mxu1 %v1283_v29 }
 0x290   :  { %808 = vmatpush.bf16.msra.mxu1 %v1282_v31 }
 0x294   :  { %809 = vmatpush.bf16.msra.mxu1 %v1281_v42 }
 0x298   :  { %810 = vmatpush.bf16.msra.mxu1 %v1280_v43 }
 0x29c   :  { %811 = vmatpush.bf16.msra.mxu1 %v1279_v45 }
 0x2a0   :  { %812 = vmatpush.bf16.msra.mxu1 %v1278_v46 }
 0x300   :  { %v502_v8 = vpop.f32.mrf.mxu1 }
 0x301   :  { %v513_v9 = vadd.f32 %v511_v7, %v502_v8 }
 0x303   :  { %v515_v11 = vmul.f32 0.5, %v513_v9 }
 0x305   :  { %1313 = vtanh.f32 %v515_v11  ;;  %v1290_v11 = vld [vmem:[#allocation6 + $0x20] sm:$0xff] }
 0x308   :  { %v504_v13 = vpop.f32.mrf.mxu1 }
 0x309   :  { %v514_v14 = vadd.f32 %v512_v12, %v504_v13  ;;  %v1289_v12 = vld [vmem:[#allocation6 + $0x18] sm:$0xff]  ;;  %v1288_v13 = vld [vmem:[#allocation6 + $0x10] sm:$0xff] }
 0x30b   :  { %v516_v15 = vmul.f32 0.5, %v514_v14  ;;  %v1314_v16 = vpop.eup %1313  ;;  %v1287_v14 = vld [vmem:[#allocation6 + $0x8] sm:$0xff] }
 0x30c   :  { %v519_v17 = vmul.f32 0.5, %v1314_v16  ;;  %v842_v16 = vperm.slane %v1555_v21, 2 }
 0x30d   :  { %1315 = vtanh.f32 %v516_v15  ;;  %v1286_v15 = vld [vmem:[#allocation6] sm:$0xff] }
 0x30e   :  { %v1546_v22 = vadd.f32 0.5, %v519_v17 }
 0x310   :  { %v843_v17 = vmul.f32 %v842_v16, %v1546_v22 }
 0x313   :  { %v1316_v18 = vpop.eup %1315 }
 0x314   :  { %v520_v19 = vmul.f32 0.5, %v1316_v18  ;;  %v845_v18 = vperm.slane %v1555_v21, 3  ;;  %v1300_v21 = vld [vmem:[%s1585_s9] ss:$0 sm:$0xff] }
 0x316   :  { %v1548_v20 = vadd.f32 0.5, %v520_v19  ;;  %v846_v19 = vadd.f32 %v845_v18, %v843_v17 }
 0x318   :  { %v591_v24 = vpack.c.bf16 %v1548_v20, %v1546_v22 }
 0x31a   :  { %649 = vmatmul.bf16.vlgmr.msrb.gmra.mxu0 %v591_v24 }
 0x397   :  { %v650_v27 = vpop.f32.mrf.mxu0 }
 0x398   :  { %v651_v28 = vadd.f32 %v650_v27, %v592_v23 }
 0x39a   :  { %v655_v30 = vmul.f32 0.5, %v651_v28 }
 0x39c   :  { %1317 = vtanh.f32 %v655_v30 }
 0x39f   :  { %v652_v32 = vpop.f32.mrf.mxu0 }
 0x3a0   :  { %v653_v33 = vadd.f32 %v652_v32, %v592_v23  ;;  %v844_v23 = vmul.f32 %v842_v16, %v1548_v20 }
 0x3a2   :  { %v656_v34 = vmul.f32 0.5, %v653_v33  ;;  %v1318_v35 = vpop.eup %1317  ;;  %v847_v26 = vadd.f32 %v845_v18, %v844_v23 }
 0x3a3   :  { %v659_v36 = vmul.f32 0.5, %v1318_v35 }
 0x3a4   :  { %1319 = vtanh.f32 %v656_v34 }
 0x3a5   :  { %v661_v39 = vadd.f32 0.5, %v659_v36 }
 0x3aa   :  { %v1320_v37 = vpop.eup %1319 }
 0x3ab   :  { %v660_v38 = vmul.f32 0.5, %v1320_v37 }
 0x3ad   :  { %v662_v40 = vadd.f32 0.5, %v660_v38 }
 0x3af   :  { %v663_v41 = vpack.c.bf16 %v662_v40, %v661_v39 }
 0x3b1   :  { %671 = vmatpush.bf16.msrb.mxu3 %v663_v41 }
 0x3b4   :  { %1128 = vmatmul.msk.bf16.vlgmr.msrb.gmra.mxu3 %vm317_vm0, %v1526_v44  ;;  %v1293_v44 = vld [vmem:[#allocation6 + $0x38] sm:$0xff] }
 0x3b5   :  { %927 = vmatpush.bf16.msra.mxu0 %v1293_v44 }
 0x3b9   :  { %928 = vmatpush.bf16.msra.mxu0 %v1292_v57 }
 0x3bd   :  { %929 = vmatpush.bf16.msra.mxu0 %v1291_v10 }
 0x3c1   :  { %930 = vmatpush.bf16.msra.mxu0 %v1290_v11 }
 0x3c5   :  { %931 = vmatpush.bf16.msra.mxu0 %v1289_v12 }
 0x3c9   :  { %932 = vmatpush.bf16.msra.mxu0 %v1288_v13 }
 0x3cd   :  { %933 = vmatpush.bf16.msra.mxu0 %v1287_v14 }
 0x3d1   :  { %934 = vmatpush.bf16.msra.mxu0 %v1286_v15 }
 0x437   :  { %v673_v47 = vpop.f32.mrf.mxu3 }
 0x438   :  { %v680_v48 = vpack.c.bf16 %v673_v47, %v673_v47 }
 0x43a   :  { %v690_v51 = vunpack.c.l.b16 %v680_v48 }
 0x43f   :  { %v675_v49 = vpop.f32.mrf.mxu3 }
 0x440   :  { %v681_v50 = vpack.c.bf16 %v675_v49, %v675_v49 }
 0x442   :  { %v691_v52 = vunpack.c.l.b16 %v681_v50 }
 0x444   :  { %v692_v53 = vpack.c.b16 %v691_v52, %v690_v51 }
 0x446   :  { %813 = vmatmul.bf16.vlgmr.msra.gmra.mxu1 %v692_v53 }
 0x4c3   :  { %v814_v58 = vpop.f32.mrf.mxu1 }
 0x4c4   :  { %v815_v59 = vadd.f32 %v814_v58, %v801_v56 }
 0x4c6   :  { %v819_v62 = vmul.f32 0.5, %v815_v59 }
 0x4c8   :  { %1321 = vtanh.f32 %v819_v62 }
 0x4cb   :  { %v816_v0 = vpop.f32.mrf.mxu1 }
 0x4cc   :  { %v817_v1 = vadd.f32 %v816_v0, %v803_v63 }
 0x4ce   :  { %v820_v2 = vmul.f32 0.5, %v817_v1  ;;  %v1322_v3 = vpop.eup %1321 }
 0x4cf   :  { %v823_v4 = vmul.f32 0.5, %v1322_v3 }
 0x4d0   :  { %1323 = vtanh.f32 %v820_v2 }
 0x4d1   :  { %v825_v7 = vadd.f32 0.5, %v823_v4 }
 0x4d6   :  { %v1324_v5 = vpop.eup %1323 }
 0x4d7   :  { %v824_v6 = vmul.f32 0.5, %v1324_v5 }
 0x4d9   :  { %v826_v8 = vadd.f32 0.5, %v824_v6 }
 0x4db   :  { %v827_v9 = vpack.c.bf16 %v826_v8, %v825_v7 }
 0x4dd   :  { %835 = vmatpush.bf16.msra.mxu3 %v827_v9 }
 0x4e0   :  { %1193 = vmatmul.msk.bf16.vlgmr.msra.gmra.mxu3 %vm317_vm0, %v1538_v61 }
 0x563   :  { %v837_v61 = vpop.f32.mrf.mxu3 }
 0x564   :  { %v848_v24 = vadd.f32 %v846_v19, %v837_v61 }
 0x566   :  { %v850_v25 = vmul.f32 0.5, %v848_v24 }
 0x568   :  { %1325 = vtanh.f32 %v850_v25 }
 0x56b   :  { %v839_v27 = vpop.f32.mrf.mxu3 }
 0x56c   :  { %v849_v28 = vadd.f32 %v847_v26, %v839_v27 }
 0x56e   :  { %v851_v29 = vmul.f32 0.5, %v849_v28  ;;  %v1326_v30 = vpop.eup %1325 }
 0x56f   :  { %v854_v31 = vmul.f32 0.5, %v1326_v30 }
 0x570   :  { %1327 = vtanh.f32 %v851_v29 }
 0x571   :  { %v856_v34 = vadd.f32 0.5, %v854_v31 }
 0x576   :  { %v1328_v32 = vpop.eup %1327 }
 0x577   :  { %v855_v33 = vmul.f32 0.5, %v1328_v32 }
 0x579   :  { %v857_v22 = vadd.f32 0.5, %v855_v33 }
 0x57b   :  { %v858_v35 = vpack.c.bf16 %v857_v22, %v856_v34 }
 0x57d   :  { %935 = vmatmul.bf16.vlgmr.msra.gmra.mxu0 %v858_v35 }
 0x5fa   :  { %v936_v20 = vpop.f32.mrf.mxu0 }
 0x5fb   :  { %v937_v36 = vadd.f32 %v1300_v21, %v936_v20 }
 0x5fd   :  { %941 = vst [vmem:[%s1586_s10] sm:$0xff] %v937_v36 }
 0x602   :  { %v938_v37 = vpop.f32.mrf.mxu0 }
 0x603   :  { %v939_v38 = vadd.f32 %v1300_v21, %v938_v37 }
 0x605   :  { %942 = vst [vmem:[%s1586_s10 + $0x8] sm:$0xff] %v939_v38 }
 0x606   :  { %947 = vsyncpa [#allocation3], 1 }
 0x607   :  { %948 = vsyncpa [#allocation5], 1 }

</bundles_post_ra>
